<compile_context>
chip_gen: v5e
topology: v5e:2x2
jax: 0.10.0
libtpu: 0.0.40
codegen_flags: <defaults>
</compile_context>

<pallas_src>
import math
import numpy as np
import jax
import jax.numpy as jnp
from jax.experimental import pallas as pl
from jax.experimental.pallas import tpu as pltpu


def _round_up(x, n):
    return ((x + n - 1) // n) * n


def _build_invM(shape):
    """Rebuild the _MK buffers in float64: M[i] = (j - (l-1)//2)^i / i!,  invM = M^-1."""
    invs = []
    for l in shape:
        M = np.zeros((l, l), dtype=np.float64)
        for i in range(l):
            M[i] = (np.arange(l) - (l - 1) // 2) ** i / math.factorial(i)
        invs.append(np.linalg.inv(M))
    return invs


def _m2k_kernel(m_ref, kt_ref, o_ref):
    # m_ref  : (TB, s0*s1)    one batch tile of the flattened moment tensor
    # kt_ref : (s0*s1, s0*s1) = kron(invM0, invM1)^T (constant across the grid)
    # o_ref  : (TB, s0*s1)    = m_tile @ K^T
    o_ref[...] = jnp.dot(
        m_ref[...], kt_ref[...], preferred_element_type=jnp.float32
    ).astype(o_ref.dtype)


def m2k(m, shape, *, tile_b=16384, vmem_limit_bytes=48 * 1024 * 1024):
    """Pallas port of M2K.forward for a 2-D kernel shape. m: [..., s0, s1]."""
    assert len(shape) == 2, "this Pallas port implements the 2-D kernel-shape case"
    s0, s1 = shape
    sz = s0 * s1
    sizem = m.shape
    assert tuple(sizem[-2:]) == (s0, s1)

    # TPU Pallas has no float64 vregs; compute in f32 (bf16 inputs are kept bf16
    # and fed to the MXU with an f32 accumulator).
    if m.dtype not in (jnp.float32, jnp.bfloat16):
        m = m.astype(jnp.float32)

    # Host-side (float64) construction of K^T = kron(invM0, invM1)^T, cast once.
    invM0_np, invM1_np = _build_invM(shape)
    KT = jnp.asarray(np.kron(invM0_np, invM1_np).T, dtype=jnp.float32)  # (sz, sz)

    # _packdim + flatten the kernel axes: [..., s0, s1] -> [B, s0*s1]
    mp = m.reshape((-1, sz))
    B = mp.shape[0]

    # Batch tile: multiple of 8 (sublane), at least 2 grid steps when B allows it
    # (v7x megacore), capped so double-buffered lane-padded in+out tiles
    # (4 * TB * 128 lanes * 4 B ~= 32 MiB at TB=16384) fit v7x's 64 MiB VMEM.
    TB = max(8, min(tile_b, _round_up(pl.cdiv(B, 2), 8)))
    grid = (pl.cdiv(B, TB),)
    itemsize = jnp.dtype(m.dtype).itemsize

    out = pl.pallas_call(
        _m2k_kernel,
        out_shape=jax.ShapeDtypeStruct((B, sz), m.dtype),
        grid_spec=pltpu.PrefetchScalarGridSpec(
            num_scalar_prefetch=0,
            grid=grid,
            in_specs=[
                # one big batch tile per grid step (ragged last block is masked)
                pl.BlockSpec((TB, sz), lambda b: (b, 0)),
                # small constant matrix: full array, constant index -> single DMA
                pl.BlockSpec((sz, sz), lambda b: (0, 0)),
            ],
            out_specs=pl.BlockSpec((TB, sz), lambda b: (b, 0)),
        ),
        compiler_params=pltpu.CompilerParams(
            # batch tiles are independent -> shard across TensorCores (v7x megacore)
            dimension_semantics=("parallel",),
            vmem_limit_bytes=vmem_limit_bytes,
        ),
        cost_estimate=pl.CostEstimate(
            flops=2 * B * sz * sz,
            transcendentals=0,
            bytes_accessed=2 * B * sz * itemsize + sz * sz * 4,
        ),
    )(mp, KT)

    return out.reshape(sizem)


def _numpy_ref(m, shape):
    invM0, invM1 = _build_invM(shape)
    return np.einsum(
        "ip,...pq,jq->...ij", invM0, np.asarray(m, dtype=np.float64), invM1
    )


if __name__ == "__main__":
    key = jax.random.PRNGKey(0)
    kshape = (5, 5)

    # Case 1: small batched moment tensor (like m2k(torch.randn(2, 3, 5, 5)))
    m1 = jax.random.normal(key, (2, 3) + kshape, dtype=jnp.float32)
    k1 = jax.block_until_ready(m2k(m1, kshape))
    ref1 = _numpy_ref(m1, kshape).astype(np.float32)
    assert k1.shape == m1.shape
    assert np.allclose(np.asarray(k1), ref1, rtol=1e-4, atol=1e-4)

    # Case 2: the documented single-matrix usage m2k(torch.randn(5, 5))
    m2 = jax.random.normal(jax.random.PRNGKey(1), kshape, dtype=jnp.float32)
    k2 = jax.block_until_ready(m2k(m2, kshape))
    ref2 = _numpy_ref(m2, kshape).astype(np.float32)
    assert k2.shape == m2.shape
    assert np.allclose(np.asarray(k2), ref2, rtol=1e-4, atol=1e-4)

    # Case 3: batch not divisible by the tile -> exercises the 2-step grid with a
    # ragged (masked) last block.
    m3 = jax.random.normal(jax.random.PRNGKey(2), (4, 37) + kshape, dtype=jnp.float32)
    k3 = jax.block_until_ready(m2k(m3, kshape))
    ref3 = _numpy_ref(m3, kshape).astype(np.float32)
    assert k3.shape == m3.shape
    assert np.allclose(np.asarray(k3), ref3, rtol=1e-4, atol=1e-4)

    print("KERNEL_OK")
</pallas_src>

<mosaic_0001>
module attributes {stable_mosaic.version = 11 : i64} {
  func.func @_m2k_kernel(%arg0: i32, %arg1: memref<8x25xf32, #tpu.memory_space<vmem>>, %arg2: memref<25x25xf32, #tpu.memory_space<vmem>>, %arg3: memref<8x25xf32, #tpu.memory_space<vmem>>) attributes {dimension_semantics = [#tpu.dimension_semantics<parallel>], iteration_bounds = array<i64: 1>, scalar_prefetch = 0 : i64, scratch_operands = 0 : i64, tpu.core_type = #tpu.core_type<tc>, window_params = [{transform_indices = @transform_0, window_bounds = array<i64: 8, 25>}, {pipeline_mode = #tpu.pipeline_mode<synchronous>, transform_indices = @transform_1, window_bounds = array<i64: 25, 25>}, {transform_indices = @transform_2, window_bounds = array<i64: 8, 25>}]} {
    %c0 = arith.constant 0 : index
    %c0_0 = arith.constant 0 : index
    %0 = vector.load %arg1[%c0, %c0_0] : memref<8x25xf32, #tpu.memory_space<vmem>>, vector<8x25xf32>
    %c0_1 = arith.constant 0 : index
    %c0_2 = arith.constant 0 : index
    %1 = vector.load %arg2[%c0_1, %c0_2] : memref<25x25xf32, #tpu.memory_space<vmem>>, vector<25x25xf32>
    %cst = arith.constant dense<0.000000e+00> : vector<8x25xf32>
    %2 = tpu.matmul %0, %1, %cst {dimension_numbers = #tpu.dot_dimension_numbers<[1], [0], [0], [1], [0, 0, 1, 1], [], []>} : vector<8x25xf32>, vector<25x25xf32>, vector<8x25xf32> -> vector<8x25xf32>
    %c0_3 = arith.constant 0 : index
    %c0_4 = arith.constant 0 : index
    %3 = vector.load %arg3[%c0_3, %c0_4] : memref<8x25xf32, #tpu.memory_space<vmem>>, vector<8x25xf32>
    tpu.vector_store %arg3[%c0_3, %c0_4], %2 {strides = array<i32>} : memref<8x25xf32, #tpu.memory_space<vmem>>, vector<8x25xf32>,
    return
  }
  func.func @transform_0(%arg0: i32) -> (i32, i32) {
    %c0_i32 = arith.constant 0 : i32
    %c0_i32_0 = arith.constant 0 : i32
    return %arg0, %c0_i32 : i32, i32
  }
  func.func @transform_1(%arg0: i32) -> (i32, i32) {
    %c0_i32 = arith.constant 0 : i32
    %c0_i32_0 = arith.constant 0 : i32
    %c0_i32_1 = arith.constant 0 : i32
    return %c0_i32, %c0_i32_0 : i32, i32
  }
  func.func @transform_2(%arg0: i32) -> (i32, i32) {
    %c0_i32 = arith.constant 0 : i32
    %c0_i32_0 = arith.constant 0 : i32
    return %arg0, %c0_i32 : i32, i32
  }
}

</mosaic_0001>

<bundles_post_ra>
// kernel: tpu_custom_call.1
= control target key start
LH: loop header
LB: loop body
LE: loop exit
PB: predicated region body
PF: predicated region fallthrough
CT: control target
= control target key end

     0   :  { %7 = vsyncpa [#allocation3], 0  ;;  %s208_s0 = inlined_call_operand.hbm [shape: f32[6,25], index: 0, kind: input, shape index: {}]   ;;  %s209_s1 = inlined_call_operand.hbm [shape: f32[25,25], index: 1, kind: input, shape index: {}]   ;;  %s210_s2 = inlined_call_operand.hbm [shape: f32[6,25], index: 2, kind: output, shape index: {}]  }
   0x1   :  { %8 = vsyncpa [#allocation6], 0 }
   0x2   :  { %9 = vsyncpa [#allocation4], 0  ;;  %s15_s11 = sshll.u32 %s208_s0, 4  ;;  %s179_s12 = smov [#allocation2]   ;;  %s16_s11 = int_to_ptr.hbm [resolvable:$true] %s15_s11 }
   0x3   :  { %s17_s13 = sshll.u32 %s179_s12, 4  ;;  %s25_s16 = sshll.u32 %s209_s1, 4  ;;  %s18_s13 = int_to_ptr.vmem [resolvable:$true] %s17_s13  ;;  %s26_s16 = int_to_ptr.hbm [resolvable:$true] %s25_s16 }
   0x4   :  { %20 = dma.hbm_to_vmem [thread:$0]  %s16_s11, 128, %s18_s13, [#allocation3]  }
   0x5   :  { %s180_s17 = smov [#allocation5]   ;;  %s181_s19 = smov 128  }
   0x6   :  { %s27_s18 = sshll.u32 %s180_s17, 4  ;;  %s182_s20 = smov 8   ;;  %s28_s18 = int_to_ptr.vmem [resolvable:$true] %s27_s18 }
   0x7   :  { %33 = dma.hbm_to_vmem [thread:$0]  %s26_s16, 512, %s28_s18, [#allocation6], %s181_s19, %s181_s19, %s182_s20  }
   0x8   :  { %173 = dma.done.wait [#allocation3], 128  }
   0x9   :  { %174 = vsyncadd [#allocation3], 4294967168 }
   0xa   :  { %175 = dma.done.wait [#allocation6], 512  }
   0xb   :  { %176 = vsyncadd [#allocation6], 4294966784  ;;  %vm51_vm0 = vcmask 1040384   ;;  %v46_v0 = vld [vmem:[#allocation5 + $0x18] sm:$0x1]  ;;  %v45_v1 = vld [vmem:[#allocation5 + $0x10] sm:$0xff] }
   0xc   :  { %94 = vmatpush.msk.msra.mxu0 %vm51_vm0, %v46_v0  ;;  %v44_v2 = vld [vmem:[#allocation5 + $0x8] sm:$0xff]  ;;  %v43_v3 = vld [vmem:[#allocation5] sm:$0xff]  ;;  %v42_v4 = vld [vmem:[#allocation2] sm:$0xff]  ;;  %vm47_vm1 = vcmask 203776   ;;  %s183_s0 = smov [#allocation7]   ;;  %s83_s23 = sshll.u32 %s210_s2, 4  ;;  %s84_s23 = int_to_ptr.hbm [resolvable:$true] %s83_s23 }
   0xd   :  { %s81_s1 = sshll.u32 %s183_s0, 4  ;;  %s82_s1 = int_to_ptr.vmem [resolvable:$true] %s81_s1 }
   0xe   :  { %68 = vmatpush.msra.mxu0 %v45_v1 }
  0x10   :  { %69 = vmatpush.msra.mxu0 %v44_v2 }
  0x12   :  { %70 = vmatpush.msra.mxu0 %v43_v3 }
  0x13   :  { %95 = vmatmul.msk.f32.vlgmr.msra.gmra.mxu0 %vm47_vm1, %v42_v4 }
  0x90   :  { %v72_v5 = vpop.f32.mrf.mxu0 }
  0x91   :  { %75 = vst.msk [vmem:[#allocation7] sm:$0xff] %vm47_vm1, %v72_v5 }
  0x92   :  { %86 = dma.vmem_to_hbm [thread:$0]  %s82_s1, 128, %s84_s23, [#allocation4]  }
  0x93   :  { %177 = dma.done.wait [#allocation4], 128  }
  0x94   :  { %178 = vsyncadd [#allocation4], 4294967168 }
  0x95   :  { %91 = vsyncpa [#allocation3], 1 }
  0x96   :  { %92 = vsyncpa [#allocation6], 1 }
  0x97   :  { %93 = vsyncpa [#allocation4], 1 }

</bundles_post_ra>
